<compile_context>
chip_gen: v6e
topology: v6e:2x2x1
jax: 0.10.0
libtpu: 0.0.40
codegen_flags: <defaults>
</compile_context>

<pallas_src>
import functools

import numpy as np
import jax
import jax.numpy as jnp
from jax import lax
from jax.experimental import pallas as pl
from jax.experimental.pallas import tpu as pltpu

_LANE = 128


def _round_up(x, m):
    return (x + m - 1) // m * m


# ----------------------------------------------------------------------------
# Kernel 1: nearest-neighbour search (tiled over N, running min/argmin)
# ----------------------------------------------------------------------------
def _nn_kernel(a_ref, b_ref, idx_ref, dist_ref, min_sc, arg_sc):
    # a: (2, M) interp points (resident), b: (2, TILE_N) tile of value points
    k = pl.program_id(0)
    tile_n = b_ref.shape[1]

    @pl.when(k == 0)
    def _():
        min_sc[...] = jnp.full_like(min_sc, jnp.inf)
        arg_sc[...] = jnp.zeros_like(arg_sc)

    a = a_ref[...].astype(jnp.float32)                  # (2, M)
    b = b_ref[...].astype(jnp.float32)                  # (2, TILE_N)

    # Direct (a-b)^2 on the VPU: no K=2 MXU contraction, no catastrophic
    # cancellation of the a^2 + b^2 - 2ab formulation.
    dx = a[0, :][:, None] - b[0, :][None, :]            # (M, TILE_N)
    dy = a[1, :][:, None] - b[1, :][None, :]
    d2 = dx * dx + dy * dy                              # squared distances

    col = lax.broadcasted_iota(jnp.int32, d2.shape, 1) + k * tile_n
    local_min = jnp.min(d2, axis=1, keepdims=True)      # (M, 1)
    big = jnp.iinfo(jnp.int32).max
    local_idx = jnp.min(jnp.where(d2 == local_min, col, big),
                        axis=1, keepdims=True)          # first index among ties

    better = local_min < min_sc[...]                    # strict: earlier tile wins ties
    arg_sc[...] = jnp.where(better, local_idx, arg_sc[...])
    min_sc[...] = jnp.where(better, local_min, min_sc[...])

    @pl.when(k == pl.num_programs(0) - 1)
    def _():
        idx_ref[...] = arg_sc[...]
        # sqrt only of the final M minima (EUP), not the full (M, N) matrix
        dist_ref[...] = jnp.sqrt(min_sc[...])


def nearest_neighbour_pallas(interp_points, values_points, *, tile_n_max=512):
    """interp_points: (2, M), values_points: (2, N) -> (indices (M,1), dists (M,1))."""
    m = int(interp_points.shape[1])
    n = int(values_points.shape[1])

    if n <= tile_n_max:
        tile_n, n_pad = n, n
    else:
        tile_n = tile_n_max
        n_pad = _round_up(n, tile_n)

    a = interp_points.astype(jnp.float32)
    b = values_points.astype(jnp.float32)
    if n_pad != n:
        # pad with large-but-finite coordinates -> never selected as nearest
        b = jnp.pad(b, ((0, 0), (0, n_pad - n)), constant_values=1e18)

    idx, dist = pl.pallas_call(
        _nn_kernel,
        out_shape=(
            jax.ShapeDtypeStruct((m, 1), jnp.int32),
            jax.ShapeDtypeStruct((m, 1), jnp.float32),
        ),
        grid_spec=pltpu.PrefetchScalarGridSpec(
            num_scalar_prefetch=0,
            grid=(n_pad // tile_n,),
            in_specs=[
                pl.BlockSpec((2, m), lambda k: (0, 0)),
                pl.BlockSpec((2, tile_n), lambda k: (0, k)),
            ],
            out_specs=[
                pl.BlockSpec((m, 1), lambda k: (0, 0)),
                pl.BlockSpec((m, 1), lambda k: (0, 0)),
            ],
            scratch_shapes=[
                pltpu.VMEM((m, 1), jnp.float32),   # running min d^2
                pltpu.VMEM((m, 1), jnp.int32),     # running argmin
            ],
        ),
        compiler_params=pltpu.CompilerParams(
            dimension_semantics=("arbitrary",)),
    )(a, b)
    return idx, dist


# ----------------------------------------------------------------------------
# Kernel 2: forward gather as a tiled one-hot MXU matmul over ACTIVE N-tiles
#   vals (TILE_R, TILE_N) @ onehot (TILE_N, M_pad) -> acc (TILE_R, M_pad) f32
# Only the source-grid tiles that hold at least one nearest-neighbour column
# are visited (tile table in SMEM via scalar prefetch).
# ----------------------------------------------------------------------------
@functools.partial(jax.jit, static_argnames=("tile_n", "tile_r_max"))
def gather_pallas(values_flat, onehot, active_tiles, *, tile_n, tile_r_max=512):
    """values_flat: (R, N), onehot: (K*tile_n, M_pad), active_tiles: (K,) int32."""
    r, n = values_flat.shape
    oh_rows, m_pad = onehot.shape
    num_tiles = int(active_tiles.shape[0])
    assert oh_rows == num_tiles * tile_n

    tile_r = r if r <= tile_r_max else tile_r_max
    need_mask = (n % tile_n) != 0   # a ragged last N-tile may be visited

    def kernel(tiles_ref, vals_ref, onehot_ref, out_ref, acc_ref):
        k = pl.program_id(1)

        @pl.when(k == 0)
        def _():
            acc_ref[...] = jnp.zeros_like(acc_ref)

        v = vals_ref[...]                      # native dtype -> MXU
        if need_mask:
            # zero out lanes past the real N (select, not multiply: stale VMEM
            # NaN/Inf in a partial edge block can never reach the accumulator)
            start = tiles_ref[k] * tile_n
            col = start + lax.broadcasted_iota(jnp.int32, v.shape, 1)
            v = jnp.where(col < n, v, jnp.zeros_like(v))

        acc_ref[...] += jnp.dot(v, onehot_ref[...],
                                preferred_element_type=jnp.float32)

        @pl.when(k == pl.num_programs(1) - 1)
        def _():
            out_ref[...] = acc_ref[...].astype(out_ref.dtype)

    return pl.pallas_call(
        kernel,
        out_shape=jax.ShapeDtypeStruct((r, m_pad), values_flat.dtype),
        grid_spec=pltpu.PrefetchScalarGridSpec(
            num_scalar_prefetch=1,
            grid=(pl.cdiv(r, tile_r), num_tiles),
            in_specs=[
                pl.BlockSpec((tile_r, tile_n), lambda i, k, tiles: (i, tiles[k])),
                pl.BlockSpec((tile_n, m_pad), lambda i, k, tiles: (k, 0)),
            ],
            out_specs=pl.BlockSpec((tile_r, m_pad), lambda i, k, tiles: (i, 0)),
            scratch_shapes=[pltpu.VMEM((tile_r, m_pad), jnp.float32)],
        ),
        compiler_params=pltpu.CompilerParams(
            dimension_semantics=("parallel", "arbitrary")),
    )(active_tiles, values_flat, onehot)


# ----------------------------------------------------------------------------
# Module wrapper (mirrors the PyTorch Interpolator)
# ----------------------------------------------------------------------------
class InterpolatorPallas:
    def __init__(self, interp_points, values_points, mode="nearest", *,
                 tile_n=512, tile_r=512):
        assert tile_n % _LANE == 0, "tile_n must be a multiple of 128"
        m = int(interp_points.shape[1])
        n = int(values_points.shape[1])

        indices, dists = nearest_neighbour_pallas(
            interp_points, values_points, tile_n_max=tile_n)
        self.nearest_neighbour = indices                 # (M, 1) int32
        self.nearest_neighbour_values = dists            # (M, 1) float32
        self.wrf_grid = values_points
        self.stations_grid = interp_points

        self._m = m
        self._n = n
        self._m_pad = _round_up(m, _LANE)
        self._tile_n = n if n <= tile_n else tile_n
        self._tile_r_max = tile_r

        # Active source-grid tiles (holding at least one NN index) plus a
        # compact one-hot selection matrix over just those tiles, built once
        # at init.  The forward kernel only streams these tiles of `values`.
        # TODO(synk): one-hot-matmul gather is not value-identical to indexing
        # when `values` contains Inf/NaN (0 * Inf = NaN contamination).
        idx_np = np.asarray(jax.device_get(indices)).reshape(-1)      # (M,)
        tile_ids = np.unique(idx_np // self._tile_n).astype(np.int32)  # (K,)
        pos = {int(t): j for j, t in enumerate(tile_ids)}
        rows = np.array(
            [pos[int(i) // self._tile_n] * self._tile_n + int(i) % self._tile_n
             for i in idx_np], dtype=np.int64)
        onehot = np.zeros((len(tile_ids) * self._tile_n, self._m_pad),
                          dtype=np.float32)
        onehot[rows, np.arange(m)] = 1.0
        self._active_tiles = jnp.asarray(tile_ids, dtype=jnp.int32)
        self._onehot_f32 = jnp.asarray(onehot)            # (K*tile_n, M_pad)
        self._onehot_cache = {"float32": self._onehot_f32}

    def calc_bilinear_coefs(self):
        pass

    def _onehot_as(self, dtype):
        key = np.dtype(dtype).name
        if key not in self._onehot_cache:
            self._onehot_cache[key] = self._onehot_f32.astype(dtype)
        return self._onehot_cache[key]

    def __call__(self, values):
        # values: (..., N) -> (..., M, 1)   == torch values[..., nn_idx(M,1)]
        lead = values.shape[:-1]
        n = values.shape[-1]
        assert n == self._n, f"last dim {n} != number of grid points {self._n}"
        r = int(np.prod(lead)) if lead else 1

        out_dtype = values.dtype
        if jnp.issubdtype(out_dtype, jnp.floating):
            compute_dtype = out_dtype
        else:
            # TODO(synk): one-hot matmul is exact only for |int| < 2^24; a true
            # DMA gather would be needed for full int32 fidelity.
            compute_dtype = jnp.float32

        flat = values.reshape(r, n).astype(compute_dtype)
        out = gather_pallas(flat, self._onehot_as(compute_dtype),
                            self._active_tiles,
                            tile_n=self._tile_n, tile_r_max=self._tile_r_max)
        out = out[:, :self._m].astype(out_dtype)
        return out.reshape(*lead, self._m, 1)

    forward = __call__


# ----------------------------------------------------------------------------
if __name__ == "__main__":
    key = jax.random.PRNGKey(0)
    k1, k2, k3, k4, k5, k6 = jax.random.split(key, 6)

    # --- case 1: single-tile path --------------------------------------------
    M, N, B, C = 8, 128, 2, 4
    interp_points = jax.random.uniform(k1, (2, M), dtype=jnp.float32) * 10.0
    values_points = jax.random.uniform(k2, (2, N), dtype=jnp.float32) * 10.0
    values = jax.random.normal(k3, (B, C, N), dtype=jnp.float32)

    interp = InterpolatorPallas(interp_points, values_points)
    out = jax.block_until_ready(interp(values))

    dx = interp_points[0][:, None] - values_points[0][None, :]
    dy = interp_points[1][:, None] - values_points[1][None, :]
    d2 = dx * dx + dy * dy
    idx_ref = jnp.argmin(d2, axis=1)
    dist_ref = jnp.sqrt(jnp.min(d2, axis=1))
    out_ref = values[..., idx_ref][..., None]             # (B, C, M, 1)

    assert out.shape == (B, C, M, 1), out.shape
    assert jnp.array_equal(interp.nearest_neighbour[:, 0],
                           idx_ref.astype(jnp.int32))
    assert jnp.allclose(interp.nearest_neighbour_values[:, 0], dist_ref,
                        atol=1e-5, rtol=1e-5)
    assert jnp.allclose(out, out_ref, atol=1e-6, rtol=1e-6)

    # --- case 2: multi-tile active-tile path with a ragged last tile ---------
    M2, N2, B2 = 10, 300, 3
    interp_points2 = jax.random.uniform(k4, (2, M2), dtype=jnp.float32) * 10.0
    values_points2 = jax.random.uniform(k5, (2, N2), dtype=jnp.float32) * 10.0
    values2 = jax.random.normal(k6, (B2, N2), dtype=jnp.float32)

    interp2 = InterpolatorPallas(interp_points2, values_points2, tile_n=128)
    out2 = jax.block_until_ready(interp2(values2))

    dx2 = interp_points2[0][:, None] - values_points2[0][None, :]
    dy2 = interp_points2[1][:, None] - values_points2[1][None, :]
    d22 = dx2 * dx2 + dy2 * dy2
    idx_ref2 = jnp.argmin(d22, axis=1)
    out_ref2 = values2[..., idx_ref2][..., None]           # (B2, M2, 1)

    assert out2.shape == (B2, M2, 1), out2.shape
    assert jnp.array_equal(interp2.nearest_neighbour[:, 0],
                           idx_ref2.astype(jnp.int32))
    assert jnp.allclose(out2, out_ref2, atol=1e-6, rtol=1e-6)

    print("KERNEL_OK")
</pallas_src>

<mosaic_0001>
module attributes {stable_mosaic.version = 11 : i64} {
  func.func @_nn_kernel(%arg0: i32, %arg1: memref<2x8xf32, #tpu.memory_space<vmem>>, %arg2: memref<2x128xf32, #tpu.memory_space<vmem>>, %arg3: memref<8x1xi32, #tpu.memory_space<vmem>>, %arg4: memref<8x1xf32, #tpu.memory_space<vmem>>, %arg5: memref<8x1xf32, #tpu.memory_space<vmem>>, %arg6: memref<8x1xi32, #tpu.memory_space<vmem>>) attributes {dimension_semantics = [#tpu.dimension_semantics<arbitrary>], iteration_bounds = array<i64: 1>, scalar_prefetch = 0 : i64, scratch_operands = 2 : i64, tpu.core_type = #tpu.core_type<tc>, window_params = [{pipeline_mode = #tpu.pipeline_mode<synchronous>, transform_indices = @transform_0, window_bounds = array<i64: 2, 8>}, {transform_indices = @transform_1, window_bounds = array<i64: 2, 128>}, {pipeline_mode = #tpu.pipeline_mode<synchronous>, transform_indices = @transform_2, window_bounds = array<i64: 8, 1>}, {pipeline_mode = #tpu.pipeline_mode<synchronous>, transform_indices = @transform_3, window_bounds = array<i64: 8, 1>}]} {
    %c0_i32 = arith.constant 0 : i32
    %0 = arith.cmpi eq, %arg0, %c0_i32 : i32
    %1 = arith.extui %0 : i1 to i32
    %c0_i32_0 = arith.constant 0 : i32
    %2 = arith.cmpi ne, %1, %c0_i32_0 : i32
    scf.if %2 {
      %cst_17 = arith.constant 0x7F800000 : f32
      %49 = vector.broadcast %cst_17 : f32 to vector<8x1xf32>
      %c0_18 = arith.constant 0 : index
      %c0_19 = arith.constant 0 : index
      %50 = vector.load %arg5[%c0_18, %c0_19] : memref<8x1xf32, #tpu.memory_space<vmem>>, vector<8x1xf32>
      tpu.vector_store %arg5[%c0_18, %c0_19], %49 {strides = array<i32>} : memref<8x1xf32, #tpu.memory_space<vmem>>, vector<8x1xf32>,
      %c0_i32_20 = arith.constant 0 : i32
      %51 = vector.broadcast %c0_i32_20 : i32 to vector<8x1xi32>
      %c0_21 = arith.constant 0 : index
      %c0_22 = arith.constant 0 : index
      %52 = vector.load %arg6[%c0_21, %c0_22] : memref<8x1xi32, #tpu.memory_space<vmem>>, vector<8x1xi32>
      tpu.vector_store %arg6[%c0_21, %c0_22], %51 {strides = array<i32>} : memref<8x1xi32, #tpu.memory_space<vmem>>, vector<8x1xi32>,
    } else {
    }
    %c0 = arith.constant 0 : index
    %c0_1 = arith.constant 0 : index
    %3 = vector.load %arg1[%c0, %c0_1] : memref<2x8xf32, #tpu.memory_space<vmem>>, vector<2x8xf32>
    %c0_2 = arith.constant 0 : index
    %c0_3 = arith.constant 0 : index
    %4 = vector.load %arg2[%c0_2, %c0_3] : memref<2x128xf32, #tpu.memory_space<vmem>>, vector<2x128xf32>
    %5 = vector.extract_strided_slice %3 {offsets = [0, 0], sizes = [1, 8], strides = [1, 1]} : vector<2x8xf32> to vector<1x8xf32>
    %6 = vector.shape_cast %5 : vector<1x8xf32> to vector<8xf32>
    %7 = vector.shape_cast %6 : vector<8xf32> to vector<8x1xf32>
    %8 = vector.extract_strided_slice %4 {offsets = [0, 0], sizes = [1, 128], strides = [1, 1]} : vector<2x128xf32> to vector<1x128xf32>
    %9 = vector.shape_cast %8 : vector<1x128xf32> to vector<128xf32>
    %10 = vector.shape_cast %9 : vector<128xf32> to vector<1x128xf32>
    %11 = vector.broadcast %7 : vector<8x1xf32> to vector<8x128xf32>
    %12 = vector.broadcast %10 : vector<1x128xf32> to vector<8x128xf32>
    %13 = arith.subf %11, %12 : vector<8x128xf32>
    %14 = vector.extract_strided_slice %3 {offsets = [1, 0], sizes = [1, 8], strides = [1, 1]} : vector<2x8xf32> to vector<1x8xf32>
    %15 = vector.shape_cast %14 : vector<1x8xf32> to vector<8xf32>
    %16 = vector.shape_cast %15 : vector<8xf32> to vector<8x1xf32>
    %17 = vector.extract_strided_slice %4 {offsets = [1, 0], sizes = [1, 128], strides = [1, 1]} : vector<2x128xf32> to vector<1x128xf32>
    %18 = vector.shape_cast %17 : vector<1x128xf32> to vector<128xf32>
    %19 = vector.shape_cast %18 : vector<128xf32> to vector<1x128xf32>
    %20 = vector.broadcast %16 : vector<8x1xf32> to vector<8x128xf32>
    %21 = vector.broadcast %19 : vector<1x128xf32> to vector<8x128xf32>
    %22 = arith.subf %20, %21 : vector<8x128xf32>
    %23 = arith.mulf %13, %13 : vector<8x128xf32>
    %24 = arith.mulf %22, %22 : vector<8x128xf32>
    %25 = arith.addf %23, %24 : vector<8x128xf32>
    %26 = tpu.iota {dimensions = array<i32: 1>} : vector<8x128xi32>
    %c128_i32 = arith.constant 128 : i32
    %27 = arith.muli %arg0, %c128_i32 : i32
    %28 = vector.broadcast %27 : i32 to vector<8x128xi32>
    %29 = arith.addi %26, %28 : vector<8x128xi32>
    %cst = arith.constant dense<0x7F800000> : vector<8xf32>
    %30 = vector.multi_reduction <minimumf>, %25, %cst [1] : vector<8x128xf32> to vector<8xf32>
    %31 = vector.shape_cast %30 : vector<8xf32> to vector<8x1xf32>
    %32 = vector.broadcast %31 : vector<8x1xf32> to vector<8x128xf32>
    %33 = arith.cmpf oeq, %25, %32 : vector<8x128xf32>
    %c2147483647_i32 = arith.constant 2147483647 : i32
    %34 = vector.broadcast %c2147483647_i32 : i32 to vector<8x128xi32>
    %35 = arith.select %33, %29, %34 : vector<8x128xi1>, vector<8x128xi32>
    %cst_4 = arith.constant dense<2147483647> : vector<8xi32>
    %36 = vector.multi_reduction <minsi>, %35, %cst_4 [1] : vector<8x128xi32> to vector<8xi32>
    %37 = vector.shape_cast %36 : vector<8xi32> to vector<8x1xi32>
    %c0_5 = arith.constant 0 : index
    %c0_6 = arith.constant 0 : index
    %38 = vector.load %arg5[%c0_5, %c0_6] : memref<8x1xf32, #tpu.memory_space<vmem>>, vector<8x1xf32>
    %39 = arith.cmpf olt, %31, %38 : vector<8x1xf32>
    %c0_7 = arith.constant 0 : index
    %c0_8 = arith.constant 0 : index
    %40 = vector.load %arg6[%c0_7, %c0_8] : memref<8x1xi32, #tpu.memory_space<vmem>>, vector<8x1xi32>
    %41 = arith.select %39, %37, %40 : vector<8x1xi1>, vector<8x1xi32>
    %c0_9 = arith.constant 0 : index
    %c0_10 = arith.constant 0 : index
    %42 = vector.load %arg6[%c0_9, %c0_10] : memref<8x1xi32, #tpu.memory_space<vmem>>, vector<8x1xi32>
    tpu.vector_store %arg6[%c0_9, %c0_10], %41 {strides = array<i32>} : memref<8x1xi32, #tpu.memory_space<vmem>>, vector<8x1xi32>,
    %c0_11 = arith.constant 0 : index
    %c0_12 = arith.constant 0 : index
    %43 = vector.load %arg5[%c0_11, %c0_12] : memref<8x1xf32, #tpu.memory_space<vmem>>, vector<8x1xf32>
    %44 = arith.select %39, %31, %43 : vector<8x1xi1>, vector<8x1xf32>
    %c0_13 = arith.constant 0 : index
    %c0_14 = arith.constant 0 : index
    %45 = vector.load %arg5[%c0_13, %c0_14] : memref<8x1xf32, #tpu.memory_space<vmem>>, vector<8x1xf32>
    tpu.vector_store %arg5[%c0_13, %c0_14], %44 {strides = array<i32>} : memref<8x1xf32, #tpu.memory_space<vmem>>, vector<8x1xf32>,
    %c0_i32_15 = arith.constant 0 : i32
    %46 = arith.cmpi eq, %arg0, %c0_i32_15 : i32
    %47 = arith.extui %46 : i1 to i32
    %c0_i32_16 = arith.constant 0 : i32
    %48 = arith.cmpi ne, %47, %c0_i32_16 : i32
    scf.if %48 {
      %c0_17 = arith.constant 0 : index
      %c0_18 = arith.constant 0 : index
      %49 = vector.load %arg6[%c0_17, %c0_18] : memref<8x1xi32, #tpu.memory_space<vmem>>, vector<8x1xi32>
      %c0_19 = arith.constant 0 : index
      %c0_20 = arith.constant 0 : index
      %50 = vector.load %arg3[%c0_19, %c0_20] : memref<8x1xi32, #tpu.memory_space<vmem>>, vector<8x1xi32>
      tpu.vector_store %arg3[%c0_19, %c0_20], %49 {strides = array<i32>} : memref<8x1xi32, #tpu.memory_space<vmem>>, vector<8x1xi32>,
      %c0_21 = arith.constant 0 : index
      %c0_22 = arith.constant 0 : index
      %51 = vector.load %arg5[%c0_21, %c0_22] : memref<8x1xf32, #tpu.memory_space<vmem>>, vector<8x1xf32>
      %52 = math.sqrt %51 : vector<8x1xf32>
      %c0_23 = arith.constant 0 : index
      %c0_24 = arith.constant 0 : index
      %53 = vector.load %arg4[%c0_23, %c0_24] : memref<8x1xf32, #tpu.memory_space<vmem>>, vector<8x1xf32>
      tpu.vector_store %arg4[%c0_23, %c0_24], %52 {strides = array<i32>} : memref<8x1xf32, #tpu.memory_space<vmem>>, vector<8x1xf32>,
    } else {
    }
    return
  }
  func.func @transform_0(%arg0: i32) -> (i32, i32) {
    %c0_i32 = arith.constant 0 : i32
    %c0_i32_0 = arith.constant 0 : i32
    %c0_i32_1 = arith.constant 0 : i32
    return %c0_i32, %c0_i32_0 : i32, i32
  }
  func.func @transform_1(%arg0: i32) -> (i32, i32) {
    %c0_i32 = arith.constant 0 : i32
    %c0_i32_0 = arith.constant 0 : i32
    return %c0_i32, %arg0 : i32, i32
  }
  func.func @transform_2(%arg0: i32) -> (i32, i32) {
    %c0_i32 = arith.constant 0 : i32
    %c0_i32_0 = arith.constant 0 : i32
    %c0_i32_1 = arith.constant 0 : i32
    return %c0_i32, %c0_i32_0 : i32, i32
  }
  func.func @transform_3(%arg0: i32) -> (i32, i32) {
    %c0_i32 = arith.constant 0 : i32
    %c0_i32_0 = arith.constant 0 : i32
    %c0_i32_1 = arith.constant 0 : i32
    return %c0_i32, %c0_i32_0 : i32, i32
  }
}

</mosaic_0001>

<bundles_post_ra>
// kernel: tpu_custom_call.1
= control target key start
LH: loop header
LB: loop body
LE: loop exit
PB: predicated region body
PF: predicated region fallthrough
CT: control target
= control target key end

     0   :  { %9 = vsyncpa [#allocation5], 0  ;;  %s223_s0 = inlined_call_operand.hbm [shape: f32[2,8], index: 0, kind: input, shape index: {}]   ;;  %s224_s1 = inlined_call_operand.hbm [shape: f32[2,128], index: 1, kind: input, shape index: {}]   ;;  %s225_s2 = inlined_call_operand.vmem [shape: s32[8,1], index: 2, kind: output, shape index: {0}]   ;;  %s226_s3 = inlined_call_operand.vmem [shape: f32[8,1], index: 3, kind: output, shape index: {1}]  }
   0x1   :  { %10 = vsyncpa [#allocation7], 0  ;;  %s179_s12 = smov [#allocation4]   ;;  %s180_s14 = smov [#allocation6]  }
   0x2   :  { %s17_s13 = sshll.u32 %s179_s12, 4  ;;  %s27_s15 = sshll.u32 %s180_s14, 4  ;;  %s18_s13 = int_to_ptr.vmem [resolvable:$true] %s17_s13  ;;  %s28_s15 = int_to_ptr.vmem [resolvable:$true] %s27_s15 }
   0x3   :  { %s143_s16 = scalar_lea.vmem %s18_s13, 32  ;;  %p148_p1 = scmp.lt.s32.totalorder %s18_s13, %s18_s13 }
   0x4   :  { %p144_p0 = scmp.ne.s32.totalorder %s18_s13, %s143_s16  ;;  %p149_p2 = scmp.lt.s32.totalorder %s143_s16, %s143_s16 }
   0x6   :  { %p150_p3 = por %p149_p2, %p148_p1 }
   0x8   :  { %p151_p4 = pnand %p150_p3, %p144_p0 }
   0xa   :  { %154 = shalt.err (!%p151_p4)
}
   0xb   :  { %20 = dma.hbm_to_vmem [thread:$0]  %s223_s0, 32, %s18_s13, [#allocation5]  }
   0xc   :  { %s163_s19 = scalar_lea.vmem %s28_s15, 32  ;;  %p168_p6 = scmp.lt.s32.totalorder %s28_s15, %s28_s15 }
   0xd   :  { %p164_p5 = scmp.ne.s32.totalorder %s28_s15, %s163_s19  ;;  %p169_p7 = scmp.lt.s32.totalorder %s163_s19, %s163_s19 }
   0xf   :  { %p170_p8 = por %p169_p7, %p168_p6 }
  0x11   :  { %p171_p9 = pnand %p170_p8, %p164_p5 }
  0x13   :  { %174 = shalt.err (!%p171_p9)
}
  0x14   :  { %30 = dma.hbm_to_vmem [thread:$0]  %s224_s1, 32, %s28_s15, [#allocation7]  }
  0x15   :  { %175 = dma.done.wait [#allocation5], 32  }
  0x16   :  { %176 = vsyncadd [#allocation5], 4294967264 }
  0x17   :  { %177 = dma.done.wait [#allocation7], 32  }
  0x18   :  { %178 = vsyncadd [#allocation7], 4294967264  ;;  %v46_v0 = vlaneseq  ;;  %v44_v4 = vld [vmem:[#allocation4] sm:$0x3]  ;;  %vm41_vm0 = vcmask 7168   ;;  %v181_v6 = vmov inf  }
  0x19   :  { %42 = vst.msk [vmem:[#allocation2] sm:$0xff] %vm41_vm0, %v181_v6  ;;  %v45_v8 = vld [vmem:[#allocation6] sm:$0x3]  ;;  %v182_v26 = vmov 0  }
  0x1a   :  { %v47_v1 = vshrl.u32 %v46_v0, 7  ;;  %v74_v19 = vand.u32 127, %v46_v0  ;;  %43 = vst.msk [vmem:[#allocation3] sm:$0xff] %vm41_vm0, %v182_v26 }
  0x1c   :  { %v48_v2 = vsub.s32 0, %v47_v1  ;;  %v60_v3 = vsub.s32 1, %v47_v1 }
  0x1e   :  { %v49_v5 = vrot.slane %v44_v4, %v48_v2  ;;  %v61_v7 = vrot.slane %v44_v4, %v60_v3  ;;  %v56_v9 = vrot.slane %v45_v8, %v48_v2  ;;  %v68_v11 = vrot.slane %v45_v8, %v60_v3 }
  0x20   :  { %51 = vbcast.lane.b32.xlu0 %v49_v5, 256  ;;  %v96_v18 = vld [vmem:[#allocation2] sm:$0xff] }
  0x21   :  { %v98_v40 = vld [vmem:[#allocation3] sm:$0xff] }
  0x24   :  { %63 = vbcast.lane.b32.xlu0 %v61_v7, 256 }
  0x92   :  { %v52_v10 = vpop.permute.xlu0 %51 }
  0x93   :  { %v57_v12 = vsub.f32 %v52_v10, %v56_v9 }
  0x95   :  { %v70_v15 = vmul.f32 %v57_v12, %v57_v12 }
  0x96   :  { %v64_v13 = vpop.permute.xlu0 %63 }
  0x97   :  { %v69_v14 = vsub.f32 %v64_v13, %v68_v11 }
  0x99   :  { %v71_v16 = vmul.f32 %v69_v14, %v69_v14 }
  0x9b   :  { %v72_v17 = vadd.f32 %v71_v16, %v70_v15 }
  0x9d   :  { %78 = vmin.xlane.f32.xlu1 %v72_v17 }
 0x126   :  { %v79_v20 = vpop.xlane.xlu1 %78 }
 0x127   :  { %vm80_vm1 = vcmp.eq.f32.partialorder %v72_v17, %v79_v20  ;;  %vm97_vm2 = vcmp.lt.f32.partialorder %v79_v20, %v96_v18 }
 0x128   :  { %v103_v21 = vsel %vm97_vm2, %v79_v20, %v96_v18  ;;  %v81_v22 = vsel %vm80_vm1, %v74_v19, 2147483647 }
 0x129   :  { %104 = vst.msk [vmem:[#allocation2] sm:$0xff] %vm41_vm0, %v103_v21  ;;  %v83_v23 = vshra.s32 %v81_v22, 16  ;;  %v82_v32 = vand.u32 65535, %v81_v22 }
 0x12b   :  { %v85_v24 = vcvt.s32.f32 %v83_v23  ;;  %v84_v34 = vcvt.s32.f32 %v82_v32 }
 0x12d   :  { %86 = vmin.xlane.f32.xlu1 %v85_v24 }
 0x130   :  { %v110_v25 = vld [vmem:[#allocation2] sm:$0xff] }
 0x131   :  { %133 = vrsqrt.f32 %v110_v25  ;;  %vm113_vm3 = vcmp.eq.f32.partialorder %v110_v25, inf  ;;  %v116_v29 = vand.u32 2147483648, %v110_v25  ;;  %vm115_vm4 = vcmp.eq.f32.partialorder %v110_v25, 0.0 }
 0x13e   :  { %v134_v27 = vpop.eup %133 }
 0x13f   :  { %v112_v28 = vmul.f32 %v134_v27, %v110_v25 }
 0x141   :  { %v114_v30 = vsel %vm113_vm3, %v110_v25, %v112_v28 }
 0x142   :  { %v117_v31 = vsel %vm115_vm4, %v116_v29, %v114_v30 }
 0x143   :  { %118 = vst.msk [vmem:[%s226_s3] sm:$0xff] %vm41_vm0, %v117_v31 }
 0x1b6   :  { %v87_v33 = vpop.xlane.xlu1 %86 }
 0x1b7   :  { %vm88_vm5 = vcmp.eq.f32.partialorder %v85_v24, %v87_v33  ;;  %v93_v36 = vcvt.f32.s32 %v87_v33 }
 0x1b8   :  { %v89_v35 = vsel %vm88_vm5, %v84_v34, inf }
 0x1b9   :  { %90 = vmin.xlane.f32.xlu0 %v89_v35  ;;  %v94_v38 = vshll.u32 %v93_v36, 16 }
 0x242   :  { %v91_v37 = vpop.xlane.xlu0 %90 }
 0x243   :  { %v92_v39 = vcvt.f32.s32 %v91_v37 }
 0x245   :  { %v95_v41 = vadd.s32 %v94_v38, %v92_v39 }
 0x247   :  { %v99_v42 = vsel %vm97_vm2, %v95_v41, %v98_v40 }
 0x248   :  { %101 = vst.msk [vmem:[#allocation3] sm:$0xff] %vm41_vm0, %v99_v42 }
 0x24f   :  { %v108_v43 = vld [vmem:[#allocation3] sm:$0xff] }
 0x250   :  { %109 = vst.msk [vmem:[%s225_s2] sm:$0xff] %vm41_vm0, %v108_v43 }
 0x251   :  { %127 = vsyncpa [#allocation5], 1 }
 0x252   :  { %128 = vsyncpa [#allocation7], 1 }

</bundles_post_ra>
